<compile_context>
chip_gen: v6e
topology: v6e:2x2x1
jax: 0.10.0
libtpu: 0.0.40
codegen_flags: <defaults>
</compile_context>

<pallas_src>
import jax
import jax.numpy as jnp
from jax import lax
from jax.experimental import pallas as pl
from jax.experimental.pallas import tpu as pltpu

BN_EPS = 1e-5
INTER_DTYPE = jnp.bfloat16   # storage dtype of the h1 / h2 intermediates


# ---------------------------------------------------------------------------
# In-kernel helpers
# ---------------------------------------------------------------------------
def _lane_partial_stats(h):
    """Per-channel lane-partial sum / sum-of-squares of h [C, Nt] (f32).

    Returns [C, 128] partials: pure VPU adds over static lane-tile slices, no
    cross-lane reduction inside the kernel.  Two independent accumulation
    chains expose a little ILP on the VALU.
    """
    n_lane_tiles = h.shape[1] // 128
    ps0 = h[:, 0:128]
    pq0 = ps0 * ps0
    for i in range(2, n_lane_tiles, 2):
        blk = h[:, i * 128:(i + 1) * 128]
        ps0 = ps0 + blk
        pq0 = pq0 + blk * blk
    if n_lane_tiles > 1:
        ps1 = h[:, 128:256]
        pq1 = ps1 * ps1
        for i in range(3, n_lane_tiles, 2):
            blk = h[:, i * 128:(i + 1) * 128]
            ps1 = ps1 + blk
            pq1 = pq1 + blk * blk
        return ps0 + ps1, pq0 + pq1
    return ps0, pq0


def _accumulate_stats(h, psum_ref, psq_ref):
    """Accumulate lane-partial stats across the last ('arbitrary') grid axis."""
    ps, pq = _lane_partial_stats(h)
    first = pl.program_id(2) == 0

    @pl.when(first)
    def _():
        psum_ref[...] = ps
        psq_ref[...] = pq

    @pl.when(jnp.logical_not(first))
    def _():
        psum_ref[...] += ps
        psq_ref[...] += pq


# ---------------------------------------------------------------------------
# Kernels
# ---------------------------------------------------------------------------
# --- variant A (D <= 128): recompute conv1, never materialize h1 -----------
def _conv1_stats_kernel(x_ref, w1_ref, psum_ref, psq_ref):
    h = jnp.dot(w1_ref[...], x_ref[...], preferred_element_type=jnp.float32)
    _accumulate_stats(h, psum_ref, psq_ref)


def _fused_conv1_bn_relu_conv2_kernel(x_ref, w1_ref, s1_ref, t1_ref, w2_ref,
                                      h2_ref, psum_ref, psq_ref):
    h = jnp.dot(w1_ref[...], x_ref[...], preferred_element_type=jnp.float32)
    a = jnp.maximum(h * s1_ref[...] + t1_ref[...], 0.0)
    h2 = jnp.dot(w2_ref[...], a, preferred_element_type=jnp.float32)
    h2_ref[...] = h2.astype(h2_ref.dtype)      # bf16 store; stats from f32 h2
    _accumulate_stats(h2, psum_ref, psq_ref)


# --- variant B (D > 128): materialize h1 in bf16 ---------------------------
def _conv1_store_stats_kernel(x_ref, w1_ref, h1_ref, psum_ref, psq_ref):
    h = jnp.dot(w1_ref[...], x_ref[...], preferred_element_type=jnp.float32)
    h1_ref[...] = h.astype(h1_ref.dtype)       # bf16 store; stats from f32 h
    _accumulate_stats(h, psum_ref, psq_ref)


def _bn_relu_conv2_kernel(h1_ref, s1_ref, t1_ref, w2_ref,
                          h2_ref, psum_ref, psq_ref):
    a = jnp.maximum(h1_ref[...] * s1_ref[...] + t1_ref[...], 0.0)   # promotes to f32
    h2 = jnp.dot(w2_ref[...], a, preferred_element_type=jnp.float32)
    h2_ref[...] = h2.astype(h2_ref.dtype)
    _accumulate_stats(h2, psum_ref, psq_ref)


# --- final pass: bn2 + relu --------------------------------------------------
def _bn_relu_kernel(h2_ref, s2_ref, t2_ref, o_ref):
    o_ref[...] = jnp.maximum(h2_ref[...] * s2_ref[...] + t2_ref[...],
                             0.0).astype(o_ref.dtype)


# ---------------------------------------------------------------------------
# Host wrapper
# ---------------------------------------------------------------------------
def _pick_n_tile(n, d, *, max_tile=2048, x_vmem_budget=8 << 20):
    """Largest lane-dense tile dividing N whose double-buffered f32 x block
    stays under the per-array VMEM budget (safe on v5e/v6e/v7x defaults)."""
    if n % 128 != 0:
        # TODO(synk): pad/mask ragged N; the kernels require N % 128 == 0.
        raise ValueError("N must be a multiple of 128")
    cap = max(128, (x_vmem_budget // (2 * 4 * max(d, 64))) // 128 * 128)
    cap = min(cap, max_tile, n)
    for t in range(cap, 0, -128):
        if n % t == 0:
            return t
    return 128


def _bn_fold(psum, psq, count, gamma, beta):
    """Reduce (split, batch, lane) partials -> per-channel scale/shift for
    y = h*scale + shift."""
    s = jnp.sum(psum, axis=(0, 1, 3))                       # [C]
    q = jnp.sum(psq, axis=(0, 1, 3))                        # [C]
    mean = s / count
    var = jnp.maximum(q / count - mean * mean, 0.0)         # clamp cancellation
    scale = gamma * lax.rsqrt(var + BN_EPS)
    shift = beta - mean * scale
    c = scale.shape[0]
    return scale.reshape(c, 1), shift.reshape(c, 1)


def pointnet_decoder(x, params, *, n_tile=None):
    """x: [B, D, N] float32 -> [B, 32, N] float32 (training-mode BN stats)."""
    B, D, N = x.shape
    # b1/b2 accepted for parity with the PyTorch module but unused in-kernel:
    # training-mode BN subtracts the post-conv mean, so they cancel exactly.
    w1, b1, g1, be1, w2, b2, g2, be2 = params
    C1, C2 = w1.shape[0], w2.shape[0]

    if n_tile is None:
        n_tile = _pick_n_tile(N, D)
    assert N % n_tile == 0 and n_tile % 128 == 0
    nt = N // n_tile
    # Core-split axis over N (v7x megacore when B alone can't feed two TCs).
    n_split = 2 if nt % 2 == 0 else 1
    npc = nt // n_split
    count = B * N

    # BlockSpec helpers for the 3-axis (split, batch, tile) reduction grid.
    def tile3(c):
        return pl.BlockSpec((None, c, n_tile),
                            lambda s, b, n: (b, 0, s * npc + n))

    def stats3(c):
        return pl.BlockSpec((None, None, c, 128), lambda s, b, n: (s, b, 0, 0))

    def const3(r, c):
        return pl.BlockSpec((r, c), lambda s, b, n: (0, 0))

    def stats_shape(c):
        return jax.ShapeDtypeStruct((n_split, B, c, 128), jnp.float32)

    reduce_params = pltpu.CompilerParams(
        dimension_semantics=("parallel", "parallel", "arbitrary"))
    grid3 = (n_split, B, npc)

    recompute_conv1 = D <= 128   # re-reading x twice beats an h1 round-trip

    if recompute_conv1:
        # Pass 1: BN1 statistics only (h1 never touches HBM).
        ps1, pq1 = pl.pallas_call(
            _conv1_stats_kernel,
            grid=grid3,
            in_specs=[tile3(D), const3(C1, D)],
            out_specs=(stats3(C1), stats3(C1)),
            out_shape=(stats_shape(C1), stats_shape(C1)),
            compiler_params=reduce_params,
        )(x, w1)
        scale1, shift1 = _bn_fold(ps1, pq1, count, g1, be1)

        # Pass 2: recompute conv1, bn1+relu, conv2; write h2 (bf16) + BN2 stats.
        h2, ps2, pq2 = pl.pallas_call(
            _fused_conv1_bn_relu_conv2_kernel,
            grid=grid3,
            in_specs=[tile3(D), const3(C1, D), const3(C1, 1), const3(C1, 1),
                      const3(C2, C1)],
            out_specs=(tile3(C2), stats3(C2), stats3(C2)),
            out_shape=(jax.ShapeDtypeStruct((B, C2, N), INTER_DTYPE),
                       stats_shape(C2), stats_shape(C2)),
            compiler_params=reduce_params,
        )(x, w1, scale1, shift1, w2)
    else:
        # Pass 1: conv1; write h1 (bf16) + BN1 stats.
        h1, ps1, pq1 = pl.pallas_call(
            _conv1_store_stats_kernel,
            grid=grid3,
            in_specs=[tile3(D), const3(C1, D)],
            out_specs=(tile3(C1), stats3(C1), stats3(C1)),
            out_shape=(jax.ShapeDtypeStruct((B, C1, N), INTER_DTYPE),
                       stats_shape(C1), stats_shape(C1)),
            compiler_params=reduce_params,
        )(x, w1)
        scale1, shift1 = _bn_fold(ps1, pq1, count, g1, be1)

        # Pass 2: bn1+relu, conv2; write h2 (bf16) + BN2 stats.
        h2, ps2, pq2 = pl.pallas_call(
            _bn_relu_conv2_kernel,
            grid=grid3,
            in_specs=[tile3(C1), const3(C1, 1), const3(C1, 1), const3(C2, C1)],
            out_specs=(tile3(C2), stats3(C2), stats3(C2)),
            out_shape=(jax.ShapeDtypeStruct((B, C2, N), INTER_DTYPE),
                       stats_shape(C2), stats_shape(C2)),
            compiler_params=reduce_params,
        )(h1, scale1, shift1, w2)

    scale2, shift2 = _bn_fold(ps2, pq2, count, g2, be2)

    # Pass 3: bn2 + relu (pure stream, fully parallel tiles).
    # TODO(synk): if a downstream Pallas consumer exists, fuse bn2+relu into it
    # (pass scale2/shift2 along) and drop this pass entirely.
    tile2 = lambda c: pl.BlockSpec((None, c, n_tile), lambda b, n: (b, 0, n))
    const2 = lambda r, c: pl.BlockSpec((r, c), lambda b, n: (0, 0))
    out = pl.pallas_call(
        _bn_relu_kernel,
        grid=(B, nt),
        in_specs=[tile2(C2), const2(C2, 1), const2(C2, 1)],
        out_specs=tile2(C2),
        out_shape=jax.ShapeDtypeStruct((B, C2, N), jnp.float32),
        compiler_params=pltpu.CompilerParams(
            dimension_semantics=("parallel", "parallel")),
    )(h2, scale2, shift2)
    return out


# ---------------------------------------------------------------------------
# Params / reference / demo
# ---------------------------------------------------------------------------
def make_params(key, d_model, c1=64, c2=32):
    ks = jax.random.split(key, 8)
    # Conv1d(d_model, c1, 1).weight[:, :, 0] -> [c1, d_model]; used directly.
    w1 = jax.random.normal(ks[0], (c1, d_model), jnp.float32) * 0.05
    b1 = jax.random.normal(ks[1], (c1,), jnp.float32) * 0.05
    g1 = 1.0 + 0.1 * jax.random.normal(ks[2], (c1,), jnp.float32)
    be1 = 0.1 * jax.random.normal(ks[3], (c1,), jnp.float32)
    w2 = jax.random.normal(ks[4], (c2, c1), jnp.float32) * 0.05
    b2 = jax.random.normal(ks[5], (c2,), jnp.float32) * 0.05
    g2 = 1.0 + 0.1 * jax.random.normal(ks[6], (c2,), jnp.float32)
    be2 = 0.1 * jax.random.normal(ks[7], (c2,), jnp.float32)
    return (w1, b1, g1, be1, w2, b2, g2, be2)


def _reference(x, params):
    # Plain-JAX reference mirroring the PyTorch module (training-mode BN, with
    # the conv biases included — they cancel under BN, matching the kernels).
    w1, b1, g1, be1, w2, b2, g2, be2 = params
    h = jnp.einsum('od,bdn->bon', w1, x) + b1[None, :, None]
    m = jnp.mean(h, axis=(0, 2), keepdims=True)
    v = jnp.var(h, axis=(0, 2), keepdims=True)
    h = jnp.maximum((h - m) * lax.rsqrt(v + BN_EPS) * g1[None, :, None]
                    + be1[None, :, None], 0.0)
    h2 = jnp.einsum('oc,bcn->bon', w2, h) + b2[None, :, None]
    m2 = jnp.mean(h2, axis=(0, 2), keepdims=True)
    v2 = jnp.var(h2, axis=(0, 2), keepdims=True)
    h2 = jnp.maximum((h2 - m2) * lax.rsqrt(v2 + BN_EPS) * g2[None, :, None]
                     + be2[None, :, None], 0.0)
    return h2


if __name__ == "__main__":
    key = jax.random.PRNGKey(0)
    kx, kp, kx2, kp2 = jax.random.split(key, 4)

    # Variant A (D <= 128): conv1 recomputed, h1 never materialized.
    # n_tile=256 -> nt=4, n_split=2 exercises the core-split + accumulation path.
    B, d_model, N = 2, 64, 1024
    x = jax.random.normal(kx, (B, d_model, N), jnp.float32)
    params = make_params(kp, d_model)
    out = jax.block_until_ready(pointnet_decoder(x, params, n_tile=256))
    assert out.shape == (B, 32, N), out.shape
    diff = jnp.abs(out - _reference(x, params))
    assert float(jnp.max(diff)) < 5e-2, float(jnp.max(diff))    # bf16 h2 storage
    assert float(jnp.mean(diff)) < 5e-3, float(jnp.mean(diff))

    # Variant B (D > 128): h1 materialized in bf16.
    B2, d2, N2 = 2, 192, 512
    x2 = jax.random.normal(kx2, (B2, d2, N2), jnp.float32)
    params2 = make_params(kp2, d2)
    out2 = jax.block_until_ready(pointnet_decoder(x2, params2))
    assert out2.shape == (B2, 32, N2), out2.shape
    diff2 = jnp.abs(out2 - _reference(x2, params2))
    assert float(jnp.max(diff2)) < 5e-2, float(jnp.max(diff2))
    assert float(jnp.mean(diff2)) < 5e-3, float(jnp.mean(diff2))

    print("KERNEL_OK")
</pallas_src>

<mosaic_0001>
module attributes {stable_mosaic.version = 11 : i64} {
  func.func @_conv1_stats_kernel(%arg0: i32, %arg1: i32, %arg2: i32, %arg3: memref<1x64x256xf32, #tpu.memory_space<vmem>>, %arg4: memref<64x64xf32, #tpu.memory_space<vmem>>, %arg5: memref<1x1x64x128xf32, #tpu.memory_space<vmem>>, %arg6: memref<1x1x64x128xf32, #tpu.memory_space<vmem>>) attributes {dimension_semantics = [#tpu.dimension_semantics<parallel>, #tpu.dimension_semantics<parallel>, #tpu.dimension_semantics<arbitrary>], iteration_bounds = array<i64: 2, 2, 2>, scalar_prefetch = 0 : i64, scratch_operands = 0 : i64, tpu.core_type = #tpu.core_type<tc>, window_params = [{transform_indices = @transform_0, window_bounds = array<i64: 1, 64, 256>}, {pipeline_mode = #tpu.pipeline_mode<synchronous>, transform_indices = @transform_1, window_bounds = array<i64: 64, 64>}, {transform_indices = @transform_2, window_bounds = array<i64: 1, 1, 64, 128>}, {transform_indices = @transform_3, window_bounds = array<i64: 1, 1, 64, 128>}]} {
    %c0 = arith.constant 0 : index
    %c0_0 = arith.constant 0 : index
    %0 = vector.load %arg4[%c0, %c0_0] : memref<64x64xf32, #tpu.memory_space<vmem>>, vector<64x64xf32>
    %c0_1 = arith.constant 0 : index
    %c0_2 = arith.constant 0 : index
    %c0_3 = arith.constant 0 : index
    %1 = vector.load %arg3[%c0_1, %c0_2, %c0_3] : memref<1x64x256xf32, #tpu.memory_space<vmem>>, vector<1x64x256xf32>
    %2 = vector.shape_cast %1 : vector<1x64x256xf32> to vector<64x256xf32>
    %cst = arith.constant dense<0.000000e+00> : vector<64x256xf32>
    %3 = tpu.matmul %0, %2, %cst {dimension_numbers = #tpu.dot_dimension_numbers<[1], [0], [0], [1], [0, 0, 1, 1], [], []>} : vector<64x64xf32>, vector<64x256xf32>, vector<64x256xf32> -> vector<64x256xf32>
    %4 = vector.extract_strided_slice %3 {offsets = [0, 0], sizes = [64, 128], strides = [1, 1]} : vector<64x256xf32> to vector<64x128xf32>
    %5 = arith.mulf %4, %4 : vector<64x128xf32>
    %6 = vector.extract_strided_slice %3 {offsets = [0, 128], sizes = [64, 128], strides = [1, 1]} : vector<64x256xf32> to vector<64x128xf32>
    %7 = arith.mulf %6, %6 : vector<64x128xf32>
    %8 = arith.addf %4, %6 : vector<64x128xf32>
    %9 = arith.addf %5, %7 : vector<64x128xf32>
    %c0_i32 = arith.constant 0 : i32
    %10 = arith.cmpi eq, %arg2, %c0_i32 : i32
    %11 = arith.extui %10 : i1 to i32
    %c0_i32_4 = arith.constant 0 : i32
    %12 = arith.cmpi ne, %11, %c0_i32_4 : i32
    scf.if %12 {
      %c0_6 = arith.constant 0 : index
      %c0_7 = arith.constant 0 : index
      %c0_8 = arith.constant 0 : index
      %c0_9 = arith.constant 0 : index
      %16 = vector.load %arg5[%c0_6, %c0_7, %c0_8, %c0_9] : memref<1x1x64x128xf32, #tpu.memory_space<vmem>>, vector<1x1x64x128xf32>
      %17 = vector.shape_cast %16 : vector<1x1x64x128xf32> to vector<64x128xf32>
      %18 = vector.shape_cast %8 : vector<64x128xf32> to vector<1x1x64x128xf32>
      tpu.vector_store %arg5[%c0_6, %c0_7, %c0_8, %c0_9], %18 {strides = array<i32>} : memref<1x1x64x128xf32, #tpu.memory_space<vmem>>, vector<1x1x64x128xf32>,
      %c0_10 = arith.constant 0 : index
      %c0_11 = arith.constant 0 : index
      %c0_12 = arith.constant 0 : index
      %c0_13 = arith.constant 0 : index
      %19 = vector.load %arg6[%c0_10, %c0_11, %c0_12, %c0_13] : memref<1x1x64x128xf32, #tpu.memory_space<vmem>>, vector<1x1x64x128xf32>
      %20 = vector.shape_cast %19 : vector<1x1x64x128xf32> to vector<64x128xf32>
      %21 = vector.shape_cast %9 : vector<64x128xf32> to vector<1x1x64x128xf32>
      tpu.vector_store %arg6[%c0_10, %c0_11, %c0_12, %c0_13], %21 {strides = array<i32>} : memref<1x1x64x128xf32, #tpu.memory_space<vmem>>, vector<1x1x64x128xf32>,
    } else {
    }
    %true = arith.constant true
    %13 = arith.xori %10, %true : i1
    %14 = arith.extui %13 : i1 to i32
    %c0_i32_5 = arith.constant 0 : i32
    %15 = arith.cmpi ne, %14, %c0_i32_5 : i32
    scf.if %15 {
      %c0_6 = arith.constant 0 : index
      %c0_7 = arith.constant 0 : index
      %c0_8 = arith.constant 0 : index
      %c0_9 = arith.constant 0 : index
      %16 = vector.load %arg5[%c0_6, %c0_7, %c0_8, %c0_9] : memref<1x1x64x128xf32, #tpu.memory_space<vmem>>, vector<1x1x64x128xf32>
      %17 = vector.shape_cast %16 : vector<1x1x64x128xf32> to vector<64x128xf32>
      %18 = arith.addf %17, %8 : vector<64x128xf32>
      %c0_10 = arith.constant 0 : index
      %c0_11 = arith.constant 0 : index
      %c0_12 = arith.constant 0 : index
      %c0_13 = arith.constant 0 : index
      %19 = vector.load %arg5[%c0_10, %c0_11, %c0_12, %c0_13] : memref<1x1x64x128xf32, #tpu.memory_space<vmem>>, vector<1x1x64x128xf32>
      %20 = vector.shape_cast %19 : vector<1x1x64x128xf32> to vector<64x128xf32>
      %21 = vector.shape_cast %18 : vector<64x128xf32> to vector<1x1x64x128xf32>
      tpu.vector_store %arg5[%c0_10, %c0_11, %c0_12, %c0_13], %21 {strides = array<i32>} : memref<1x1x64x128xf32, #tpu.memory_space<vmem>>, vector<1x1x64x128xf32>,
      %c0_14 = arith.constant 0 : index
      %c0_15 = arith.constant 0 : index
      %c0_16 = arith.constant 0 : index
      %c0_17 = arith.constant 0 : index
      %22 = vector.load %arg6[%c0_14, %c0_15, %c0_16, %c0_17] : memref<1x1x64x128xf32, #tpu.memory_space<vmem>>, vector<1x1x64x128xf32>
      %23 = vector.shape_cast %22 : vector<1x1x64x128xf32> to vector<64x128xf32>
      %24 = arith.addf %23, %9 : vector<64x128xf32>
      %c0_18 = arith.constant 0 : index
      %c0_19 = arith.constant 0 : index
      %c0_20 = arith.constant 0 : index
      %c0_21 = arith.constant 0 : index
      %25 = vector.load %arg6[%c0_18, %c0_19, %c0_20, %c0_21] : memref<1x1x64x128xf32, #tpu.memory_space<vmem>>, vector<1x1x64x128xf32>
      %26 = vector.shape_cast %25 : vector<1x1x64x128xf32> to vector<64x128xf32>
      %27 = vector.shape_cast %24 : vector<64x128xf32> to vector<1x1x64x128xf32>
      tpu.vector_store %arg6[%c0_18, %c0_19, %c0_20, %c0_21], %27 {strides = array<i32>} : memref<1x1x64x128xf32, #tpu.memory_space<vmem>>, vector<1x1x64x128xf32>,
    } else {
    }
    return
  }
  func.func @transform_0(%arg0: i32, %arg1: i32, %arg2: i32) -> (i32, i32, i32) {
    %c2_i32 = arith.constant 2 : i32
    %0 = arith.muli %arg0, %c2_i32 : i32
    %1 = arith.addi %0, %arg2 : i32
    %c0_i32 = arith.constant 0 : i32
    %c0_i32_0 = arith.constant 0 : i32
    return %arg1, %c0_i32, %1 : i32, i32, i32
  }
  func.func @transform_1(%arg0: i32, %arg1: i32, %arg2: i32) -> (i32, i32) {
    %c0_i32 = arith.constant 0 : i32
    %c0_i32_0 = arith.constant 0 : i32
    %c0_i32_1 = arith.constant 0 : i32
    return %c0_i32, %c0_i32_0 : i32, i32
  }
  func.func @transform_2(%arg0: i32, %arg1: i32, %arg2: i32) -> (i32, i32, i32, i32) {
    %c0_i32 = arith.constant 0 : i32
    %c0_i32_0 = arith.constant 0 : i32
    %c0_i32_1 = arith.constant 0 : i32
    return %arg0, %arg1, %c0_i32, %c0_i32_0 : i32, i32, i32, i32
  }
  func.func @transform_3(%arg0: i32, %arg1: i32, %arg2: i32) -> (i32, i32, i32, i32) {
    %c0_i32 = arith.constant 0 : i32
    %c0_i32_0 = arith.constant 0 : i32
    %c0_i32_1 = arith.constant 0 : i32
    return %arg0, %arg1, %c0_i32, %c0_i32_0 : i32, i32, i32, i32
  }
}

</mosaic_0001>

<bundles_post_ra>
// kernel: tpu_custom_call.1
= control target key start
LH: loop header
LB: loop body
LE: loop exit
PB: predicated region body
PF: predicated region fallthrough
CT: control target
= control target key end

     0   :  { %s1589_s0 = inlined_call_operand.hbm [shape: f32[2,64,1024], index: 0, kind: input, shape index: {}]   ;;  %s1590_s1 = inlined_call_operand.hbm [shape: f32[64,64], index: 1, kind: input, shape index: {}]   ;;  %s1591_s2 = inlined_call_operand.hbm [shape: f32[2,2,64,128], index: 2, kind: output, shape index: {0}]   ;;  %s1592_s3 = inlined_call_operand.hbm [shape: f32[2,2,64,128], index: 3, kind: output, shape index: {1}]  }
   0x1   :  { %1606 = sst [smem:[#allocation22_spill]] %s1589_s0 }
   0x2   :  { %1607 = sst [smem:[#allocation23_spill]] %s1590_s1 }
   0x3   :  { %1608 = sst [smem:[#allocation24_spill]] %s1591_s2 }
   0x4   :  { %1609 = sst [smem:[#allocation25_spill]] %s1592_s3 }
   0x5   :  { %9 = vsyncpa [#allocation3], 0 }
   0x6   :  { %11 = vsyncpa [#allocation3 + $0x1], 0 }
   0x7   :  { %12 = vsyncpa [#allocation6], 0 }
   0x8   :  { %13 = vsyncpa [#allocation4], 0 }
   0x9   :  { %15 = vsyncpa [#allocation4 + $0x1], 0 }
   0xa   :  { %16 = vsyncpa [#allocation9], 0 }
   0xb   :  { %18 = vsyncpa [#allocation9 + $0x1], 0  ;;  %s1152_s12 = smov 0   ;;  %s1154_s13 = smov 0  }
   0xc   :  { %s1156_s14 = smov 0   ;;  %s1158_s15 = smov 0  }
   0xd   :  { %s1160_s16 = smov 0   ;;  %s1162_s17 = smov 0  }
   0xe   :  { %s1164_s18 = smov 0   ;;  %s1166_s19 = smov 0  }
   0xf   :  { %s1168_s20 = smov 0   ;;  %s1170_s21 = smov 0  }
  0x10   :  { %s1172_s22 = smov 0   ;;  %s1174_s23 = smov 0  }
  0x11   :  { %s1176_s24 = smov 0  }
  0x12 LB: > { %1610 = sst [smem:[#allocation14_spill]] %s1070_s12  ;;  %s699_s25 = sadd.s32 4294967295, %s1118_s24   ;;  %s1118_s24 = sphi %s1176_s24, %s24_s24   ;;  %s1114_s23 = sphi %s1174_s23, %s1652_s23   ;;  %s1110_s22 = sphi %s1172_s22, %s1643_s22   ;;  %s1106_s21 = sphi %s1170_s21, %s1651_s21   ;;  %s1102_s20 = sphi %s1168_s20, %s1650_s20   ;;  %s1098_s19 = sphi %s1166_s19, %s1642_s19   ;;  %s1094_s18 = sphi %s1164_s18, %s1641_s18   ;;  %s1090_s17 = sphi %s1162_s17, %s1649_s17   ;;  %s1086_s16 = sphi %s1160_s16, %s1648_s16   ;;  %s1082_s15 = sphi %s1158_s15, %s1647_s15   ;;  %s1078_s14 = sphi %s1156_s14, %s1646_s14   ;;  %s1074_s13 = sphi %s1154_s13, %s1645_s13   ;;  %s1070_s12 = sphi %s1152_s12, %s1644_s12  }
  0x13   : > { %1611 = sst [smem:[#allocation15_spill]] %s1102_s20  ;;  %s700_s26 = sadd.s32 4294967294, %s1118_s24  }
  0x14   : > { %1612 = sst [smem:[#allocation16_spill]] %s1106_s21  ;;  %p63_p0 = scmp.ne.s32.totalorder %s1090_s17, %s1086_s16 }
  0x15   : > { %1613 = sst [smem:[#allocation17_spill]] %s1110_s22  ;;  %p64_p1 = scmp.eq.s32.totalorder %s1118_s24, 0 }
  0x16   : > { %1614 = sst [smem:[#allocation18_spill]] %s1118_s24  ;;  %p69_p2 = scmp.ne.s32.totalorder %s1086_s16, %s1082_s15 }
  0x17   : > { %p1221_p3 = scmp.eq.s32.totalorder %s699_s25, 0  ;;  %p1225_p4 = por %p64_p1, %p63_p0 }
  0x18   : > { %p115_p6 = scmp.ne.s32.totalorder %s1078_s14, %s1074_s13  ;;  %p116_p7 = scmp.eq.s32.totalorder %s699_s25, 7 }
  0x19   : > { %p1232_p5 = por %p1221_p3, %p69_p2  ;;  %p121_p8 = scmp.ne.s32.totalorder %s1074_s13, %s1070_s12 }
  0x1a   : > { %p122_p9 = scmp.eq.s32.totalorder %s700_s26, 7  ;;  %p703_p10 = scmp.ge.s32.totalorder %s1118_s24, 1 }
  0x1b   : > { %s1617_s30 = scalar_select %p1232_p5, 1, 0 }
  0x1c   : > { %p1241_p11 = por %p116_p7, %p115_p6  ;;  %p157_p12 = scmp.lt.s32.totalorder %s1118_s24, 9 }
  0x1d   : > { %p1246_p13 = por %p122_p9, %p121_p8  ;;  %s1120_s7 = smov [#allocation5]  }
  0x1e   : > { %s1618_s4 = scalar_select %p1241_p11, 1, 0 }
  0x1f   : > { %s1620_s5 = scalar_select %p1246_p13, 1, 0 }
  0x20   : > { %1619 = sst [smem:[#allocation19_spill]] %s1618_s4  ;;  %p1250_p0 = pnand %p703_p10, %p157_p12 }
  0x21   : > { %1621 = sst [smem:[#allocation20_spill]] %s1620_s5  ;;  %s169_s8 = sshll.u32 %s1120_s7, 4  ;;  %s170_s8 = int_to_ptr.vmem [resolvable:$true] %s169_s8 }
  0x22   : > { %p762_p1 = pneg %p1250_p0  ;;  %p778_p6 = scmp.lt.s32.totalorder %s1118_s24, 8 }
  0x23   : > { %s905_s11 = scalar_lea.vmem %s170_s8, 1024  ;;  %p913_p13 = scmp.lt.s32.totalorder %s170_s8, %s170_s8 }
  0x24   : > { %p1258_p2 = pnand %p762_p1, %p1221_p3  ;;  %p1265_p7 = pnand %p778_p6, %p1225_p4 }
  0x25   : > { %p906_p9 = scmp.ne.s32.totalorder %s170_s8, %s905_s11  ;;  %p914_p11 = scmp.lt.s32.totalorder %s905_s11, %s905_s11 }
  0x26   : > { %p896_p8 = pneg %p1258_p2 }
  0x27   : > { %p915_p5 = por %p914_p11, %p913_p13 }
  0x28   : > { %p908_p10 = pnand %p906_p9, %p896_p8 }
  0x2a   : > { %p909_p12 = pneg %p908_p10 }
  0x2c   : > { %p916_p1 = pnand %p915_p5, %p909_p12 }
  0x2e   : > { %919 = shalt.err (!%p916_p1)
}
  0x2f   : > { %s1121_s15 = smov 128   ;;  %s1122_s25 = smov 8  }
  0x30   : > { %s1625_s1 = sld [smem:[#allocation23_spill]]  ;;  %s39_s7 = sadd.s32 1, %s1110_s22 }
  0x31   : > { %s36_s11 = sadd.s32 1, %s1106_s21  ;;  %s43_s29 = sadd.s32 1, %s1114_s23 }
  0x32   : > { %p37_p4 = scmp.ge.s32.totalorder %s36_s11, 2  ;;  %s701_s5 = sshll.u32 %s1114_s23, 1 }
  0x33   : > { %s48_s12 = sadd.s32 %s1106_s21, %s701_s5  ;;  %s56_s24 = sadd.s32 1, %s1090_s17 }
  0x34   : > { %s1654_s11 = smov (%p37_p4, %s36_s11), 0  ;;  %s1656_s7 = smov (!%p37_p4, %s39_s7), %s1110_s22 }
  0x35   : > { %s183_s3 = sand.u32 1, %s1090_s17   ;;  %s708_s2 = sshll.u32 %s48_s12, 1 }
  0x36   : > { %765 = dma.hbm_to_vmem [thread:$0]  (!%p1258_p2), %s1625_s1, 1024, %s170_s8, [#allocation6], %s1121_s15, %s1121_s15, %s1122_s25  }
  0x37   : > { %p41_p5 = scmp.ge.s32.totalorder %s1656_s7, 2  ;;  %s706_s9 = sshll.u32 %s183_s3, 7 }
  0x38   : > { %s709_s26 = sshll.u32 %s1110_s22, 6  ;;  %s187_s25 = scalar_lea.vmem [#allocation2], %s706_s9 }
  0x39   : > { %s1658_s7 = smov (%p41_p5, %s1656_s7), 0  ;;  %s1660_s29 = smov (!%p41_p5, %s43_s29), %s1114_s23 }
  0x3a   : > { %1626 = sst [smem:[#allocation21_spill]] %s1658_s7  ;;  %s51_s8 = ssub.s32 %s1110_s22, %s1658_s7 }
  0x3b   : > { %p45_p11 = scmp.ge.s32.totalorder %s1660_s29, 2  ;;  %s195_s5 = sadd.s32 %s709_s26, %s708_s2 }
  0x3c   : > { %s710_s15 = sshll.u32 %s195_s5, 7  ;;  %s198_s28 = sshll.u32 %s187_s25, 4  ;;  %s1299_s28 = int_to_ptr.vmem [resolvable:$true] %s198_s28 }
  0x3d   : > { %s1662_s29 = smov (%p45_p11, %s1660_s29), 0  ;;  %s1627_s0 = sld [smem:[#allocation22_spill]] }
  0x3e   : > { %s702_s7 = sshll.u32 %s1662_s29, 1  ;;  %s100_s2 = ssub.s32 %s1114_s23, %s1662_s29 }
  0x3f   : > { %s50_s26 = sadd.s32 %s702_s7, %s1654_s11  ;;  %s102_s5 = sor.u32 %s100_s2, %s51_s8 }
  0x40   : > { %s52_s9 = ssub.s32 %s48_s12, %s50_s26  ;;  %p103_p13 = scmp.eq.s32.totalorder %s102_s5, 0 }
  0x41   : > { %s53_s25 = sor.u32 %s52_s9, %s51_s8  ;;  %s1628_s22 = sadd.s32 1, %s1078_s14 }
  0x42   : > { %p54_p2 = scmp.eq.s32.totalorder %s53_s25, 0  ;;  %s184_s21 = scalar_lea.sflag [#allocation3], %s183_s3 }
  0x43   : > { %s1297_s4 = scalar_lea.hbm %s1627_s0, %s710_s15  ;;  %p922_p6 = pneg %p1265_p7 }
  0x44   : > { %s1308_s20 = scalar_select %p103_p13, %s1078_s14, %s1628_s22  }
  0x45   : > { %s1311_s1 = scalar_select %p54_p2, %s1090_s17, %s56_s24  }
  0x46   : > { %s933_s15 = scalar_lea.vmem %s1299_s28, 2048  ;;  %s1123_s0 = smov [#allocation2]  }
  0x47   : > { %p934_p8 = scmp.ne.s32.totalorder %s1299_s28, %s933_s15  ;;  %s938_s7 = sshll.u32 %s1123_s0, 4  ;;  %s939_s7 = int_to_ptr.vmem [resolvable:$false] %s938_s7 }
  0x48   : > { %s940_s12 = scalar_lea.vmem %s939_s7, 4096  ;;  %p941_p12 = scmp.lt.s32.totalorder %s1299_s28, %s939_s7 }
  0x49   : > { %p936_p9 = pnand %p934_p8, %p922_p6  ;;  %p942_p1 = scmp.lt.s32.totalorder %s940_s12, %s933_s15 }
  0x4b   : > { %p937_p10 = pneg %p936_p9  ;;  %p943_p4 = por %p942_p1, %p941_p12 }
  0x4d   : > { %p944_p5 = pnand %p943_p4, %p937_p10 }
  0x4f   : > { %947 = shalt.err (!%p944_p5)
}
  0x50   : > { %s1124_s22 = smov 1024   ;;  %s1125_s3 = smov 256  }
  0x51   : > { %s1126_s24 = smov 16   ;;  %210 = sbr.rel (%p1250_p0) target bundleno = 394 (0x18a), region = 28 }
  0x52   : > { %769 = dma.hbm_to_vmem [thread:$0]  (!%p1265_p7), %s1297_s4, 2048, %s1299_s28, %s184_s21, %s1124_s22, %s1125_s3, %s1126_s24  }
  0x53   : > { %s212_s0 = sand.u32 (!%p1250_p0), 1, %s1086_s16   ;;  %p1629_p11 = scmp.ne.s32.totalorder (!%p1250_p0), %s1617_s30, 0 }
  0x54   : > { %s712_s8 = sshll.u32 (!%p1250_p0), %s212_s0, 7  ;;  %s213_s2 = scalar_lea.sflag (!%p1250_p0), [#allocation3], %s212_s0 }
  0x55   : > { %s1325_s26 = scalar_lea.vmem (!%p1250_p0), [#allocation2], %s712_s8 }
  0x56   : > { %1053 = dma.done.wait (%p1629_p11), %s213_s2, 2048  }
  0x57   : > { %1055 = vsyncadd (%p1629_p11), %s213_s2, 4294965248 }
  0x58   : > { %1057 = dma.done.wait (%p1221_p3), [#allocation6], 1024  }
  0x59   : > { %1059 = vsyncadd (%p1221_p3), [#allocation6], 4294966272  ;;  %s1336_s4 = sand.u32 1, %s1074_s13   ;;  %v1127_v0 = vmov 0.0   ;;  %v274_v1 = vld [vmem:[%s1325_s26 + $0x78] sm:$0xff]  ;;  %v273_v2 = vld [vmem:[%s1325_s26 + $0x70] sm:$0xff] }
  0x5a   : > { %s714_s6 = sshll.u32 %s1336_s4, 6  ;;  %364 = vmatprep.mubr.f32.mxu0 %v1127_v0  ;;  %388 = vmatprep.mubr.f32.mxu1 %v1127_v0  ;;  %v272_v3 = vld [vmem:[%s1325_s26 + $0x68] sm:$0xff]  ;;  %v271_v4 = vld [vmem:[%s1325_s26 + $0x60] sm:$0xff]  ;;  %v270_v5 = vld [vmem:[%s1325_s26 + $0x58] sm:$0xff]  ;;  %vm275_vm0 = vcmask 523264   ;;  %p724_p3 = scmp.ne.s32.totalorder %s1094_s18, 0 }
  0x5b   : > { %316 = vmatprep.subr.mxu0 %v274_v1  ;;  %736 = vmatprep.subr.mxu1 %v274_v1  ;;  %v269_v6 = vld [vmem:[%s1325_s26 + $0x50] sm:$0xff]  ;;  %v268_v7 = vld [vmem:[%s1325_s26 + $0x48] sm:$0xff]  ;;  %v267_v8 = vld [vmem:[%s1325_s26 + $0x40] sm:$0xff]  ;;  %s1391_s27 = scalar_lea.vmem [#allocation7], %s714_s6  ;;  %s1395_s30 = scalar_lea.vmem [#allocation8], %s714_s6 }
  0x5c   : > { %317 = vmatpush1.msra.mxu0 %v273_v2  ;;  %744 = vmatpush1.msra.mxu1 %v273_v2  ;;  %v266_v9 = vld [vmem:[%s1325_s26 + $0x38] sm:$0xff]  ;;  %v265_v10 = vld [vmem:[%s1325_s26 + $0x30] sm:$0xff]  ;;  %v264_v11 = vld [vmem:[%s1325_s26 + $0x28] sm:$0xff] }
  0x5d   : > { %318 = vmatprep.subr.mxu0 %v272_v3  ;;  %737 = vmatprep.subr.mxu1 %v272_v3  ;;  %v263_v12 = vld [vmem:[%s1325_s26 + $0x20] sm:$0xff]  ;;  %v262_v13 = vld [vmem:[%s1325_s26 + $0x18] sm:$0xff]  ;;  %v261_v14 = vld [vmem:[%s1325_s26 + $0x10] sm:$0xff] }
  0x5e   : > { %319 = vmatpush1.msra.mxu0 %v271_v4  ;;  %745 = vmatpush1.msra.mxu1 %v271_v4  ;;  %v260_v15 = vld [vmem:[%s1325_s26 + $0x8] sm:$0xff]  ;;  %v259_v16 = vld [vmem:[%s1325_s26] sm:$0xff]  ;;  %v253_v21 = vld [vmem:[#allocation5 + $0x10] sm:$0xff] }
  0x5f   : > { %320 = vmatprep.subr.mxu0 %v270_v5  ;;  %738 = vmatprep.subr.mxu1 %v270_v5  ;;  %v251_v17 = vld [vmem:[#allocation5] sm:$0xff]  ;;  %v252_v19 = vld [vmem:[#allocation5 + $0x8] sm:$0xff]  ;;  %v257_v22 = vld [vmem:[#allocation5 + $0x30] sm:$0xff] }
  0x60   : > { %321 = vmatpush1.msra.mxu0 %v269_v6  ;;  %746 = vmatpush1.msra.mxu1 %v269_v6  ;;  %v255_v18 = vld [vmem:[#allocation5 + $0x20] sm:$0xff]  ;;  %v256_v20 = vld [vmem:[#allocation5 + $0x28] sm:$0xff]  ;;  %v254_v23 = vld [vmem:[#allocation5 + $0x18] sm:$0xff] }
  0x61   : > { %322 = vmatprep.subr.mxu0 %v268_v7  ;;  %739 = vmatprep.subr.mxu1 %v268_v7  ;;  %v258_v24 = vld [vmem:[#allocation5 + $0x38] sm:$0xff] }
  0x62   : > { %323 = vmatpush1.msra.mxu0 %v267_v8  ;;  %747 = vmatpush1.msra.mxu1 %v267_v8 }
  0x63   : > { %324 = vmatprep.subr.mxu0 %v266_v9  ;;  %740 = vmatprep.subr.mxu1 %v266_v9 }
  0x64   : > { %325 = vmatpush1.msra.mxu0 %v265_v10  ;;  %748 = vmatpush1.msra.mxu1 %v265_v10 }
  0x65   : > { %326 = vmatprep.subr.mxu0 %v264_v11  ;;  %741 = vmatprep.subr.mxu1 %v264_v11 }
  0x66   : > { %327 = vmatpush1.msra.mxu0 %v263_v12  ;;  %749 = vmatpush1.msra.mxu1 %v263_v12 }
  0x67   : > { %328 = vmatprep.subr.mxu0 %v262_v13  ;;  %742 = vmatprep.subr.mxu1 %v262_v13 }
  0x68   : > { %329 = vmatpush1.msra.mxu0 %v261_v14  ;;  %750 = vmatpush1.msra.mxu1 %v261_v14 }
  0x69   : > { %330 = vmatprep.subr.mxu0 %v260_v15  ;;  %743 = vmatprep.subr.mxu1 %v260_v15 }
  0x6a   : > { %331 = vmatpush1.msra.mxu0 %v259_v16  ;;  %751 = vmatpush1.msra.mxu1 %v259_v16 }
  0x6b   : > { %716 = vmatmul.mubr.msk.f32.vlgmr.msra.gmra.mxu0 %vm275_vm0, %v251_v17  ;;  %720 = vmatmul.mubr.msk.f32.vlgmr.msra.gmra.mxu1 %vm275_vm0, %v255_v18 }
  0x6c   : > { %370 = vmatprep.mubr.f32.mxu0 %v1127_v0  ;;  %394 = vmatprep.mubr.f32.mxu1 %v1127_v0 }
  0x6f   : > { %717 = vmatmul.mubr.msk.f32.gmra.mxu0 %vm275_vm0, %v252_v19  ;;  %721 = vmatmul.mubr.msk.f32.gmra.mxu1 %vm275_vm0, %v256_v20 }
  0x70   : > { %376 = vmatprep.mubr.f32.mxu0 %v1127_v0  ;;  %400 = vmatprep.mubr.f32.mxu1 %v1127_v0 }
  0x73   : > { %718 = vmatmul.mubr.msk.f32.gmra.mxu0 %vm275_vm0, %v253_v21  ;;  %722 = vmatmul.mubr.msk.f32.gmra.mxu1 %vm275_vm0, %v257_v22 }
  0x74   : > { %382 = vmatprep.mubr.f32.mxu0 %v1127_v0  ;;  %406 = vmatprep.mubr.f32.mxu1 %v1127_v0 }
  0x77   : > { %719 = vmatmul.mubr.msk.f32.gmra.mxu0 %vm275_vm0, %v254_v23  ;;  %723 = vmatmul.mubr.msk.f32.gmra.mxu1 %vm275_vm0, %v258_v24 }
 0x12b   : > { %v366_v25 = vpop.f32.mrf.mxu0  ;;  %v390_v26 = vpop.f32.mrf.mxu1 }
 0x12c   : > { %v413_v27 = vmul.f32 %v366_v25, %v366_v25  ;;  %v417_v28 = vmul.f32 %v390_v26, %v390_v26 }
 0x12d   : > { %v368_v29 = vpop.f32.mrf.mxu0  ;;  %v392_v30 = vpop.f32.mrf.mxu1 }
 0x12e   : > { %v421_v31 = vmul.f32 %v368_v29, %v368_v29  ;;  %v1371_v32 = vadd.f32 %v368_v29, %v366_v25  ;;  %v425_v33 = vmul.f32 %v392_v30, %v392_v30  ;;  %v1373_v34 = vadd.f32 %v392_v30, %v390_v26 }
 0x12f   : > { %v372_v35 = vpop.f32.mrf.mxu0  ;;  %v396_v36 = vpop.f32.mrf.mxu1 }
 0x130   : > { %v1375_v37 = vadd.f32 %v421_v31, %v413_v27  ;;  %v1377_v38 = vadd.f32 %v425_v33, %v417_v28  ;;  %v414_v39 = vmul.f32 %v372_v35, %v372_v35  ;;  %v418_v40 = vmul.f32 %v396_v36, %v396_v36 }
 0x131   : > { %v374_v41 = vpop.f32.mrf.mxu0  ;;  %v398_v42 = vpop.f32.mrf.mxu1 }
 0x132   : > { %v422_v43 = vmul.f32 %v374_v41, %v374_v41  ;;  %v430_v44 = vadd.f32 %v374_v41, %v372_v35  ;;  %v426_v45 = vmul.f32 %v398_v42, %v398_v42  ;;  %v434_v46 = vadd.f32 %v398_v42, %v396_v36 }
 0x133   : > { %v378_v47 = vpop.f32.mrf.mxu0  ;;  %v402_v48 = vpop.f32.mrf.mxu1 }
 0x134   : > { %v1379_v49 = vadd.f32 %v422_v43, %v414_v39  ;;  %v1381_v50 = vadd.f32 %v426_v45, %v418_v40  ;;  %v415_v51 = vmul.f32 %v378_v47, %v378_v47  ;;  %v419_v52 = vmul.f32 %v402_v48, %v402_v48 }
 0x135   : > { %v380_v53 = vpop.f32.mrf.mxu0  ;;  %v404_v54 = vpop.f32.mrf.mxu1 }
 0x136   : > { %v423_v55 = vmul.f32 %v380_v53, %v380_v53  ;;  %v431_v56 = vadd.f32 %v380_v53, %v378_v47  ;;  %v427_v57 = vmul.f32 %v404_v54, %v404_v54  ;;  %v435_v58 = vadd.f32 %v404_v54, %v402_v48 }
 0x137   : > { %v384_v59 = vpop.f32.mrf.mxu0  ;;  %v408_v60 = vpop.f32.mrf.mxu1 }
 0x138   : > { %v1383_v61 = vadd.f32 %v423_v55, %v415_v51  ;;  %v1385_v62 = vadd.f32 %v427_v57, %v419_v52  ;;  %v416_v63 = vmul.f32 %v384_v59, %v384_v59  ;;  %v420_v0 = vmul.f32 %v408_v60, %v408_v60  ;;  %448 = sbr.rel (%p724_p3) target bundleno = 325 (0x145), region = 40 }
 0x139   : > { %v386_v1 = vpop.f32.mrf.mxu0  ;;  %v410_v2 = vpop.f32.mrf.mxu1 }
 0x13a   : > { %v424_v3 = vmul.f32 %v386_v1, %v386_v1  ;;  %v432_v4 = vadd.f32 %v386_v1, %v384_v59  ;;  %v428_v5 = vmul.f32 %v410_v2, %v410_v2  ;;  %v436_v6 = vadd.f32 %v410_v2, %v408_v60 }
 0x13c   : > { %v440_v7 = vadd.f32 %v424_v3, %v416_v63  ;;  %v1387_v8 = vadd.f32 %v428_v5, %v420_v0 }
 0x13d   : > { %449 = vst [vmem:[%s1391_s27] sm:$0xff] %v1371_v32  ;;  %450 = vst [vmem:[%s1391_s27 + $0x8] sm:$0xff] %v430_v44 }
 0x13e   : > { %451 = vst [vmem:[%s1391_s27 + $0x10] sm:$0xff] %v431_v56  ;;  %452 = vst [vmem:[%s1391_s27 + $0x18] sm:$0xff] %v432_v4 }
 0x13f   : > { %453 = vst [vmem:[%s1391_s27 + $0x20] sm:$0xff] %v1373_v34  ;;  %454 = vst [vmem:[%s1391_s27 + $0x28] sm:$0xff] %v434_v46 }
 0x140   : > { %455 = vst [vmem:[%s1391_s27 + $0x30] sm:$0xff] %v435_v58  ;;  %456 = vst [vmem:[%s1391_s27 + $0x38] sm:$0xff] %v436_v6 }
 0x141   : > { %457 = vst [vmem:[%s1395_s30] sm:$0xff] %v1375_v37  ;;  %458 = vst [vmem:[%s1395_s30 + $0x8] sm:$0xff] %v1379_v49 }
 0x142   : > { %459 = vst [vmem:[%s1395_s30 + $0x10] sm:$0xff] %v1383_v61  ;;  %460 = vst [vmem:[%s1395_s30 + $0x18] sm:$0xff] %v440_v7 }
 0x143   : > { %461 = vst [vmem:[%s1395_s30 + $0x20] sm:$0xff] %v1377_v38  ;;  %462 = vst [vmem:[%s1395_s30 + $0x28] sm:$0xff] %v1381_v50 }
 0x144   : > { %463 = vst [vmem:[%s1395_s30 + $0x30] sm:$0xff] %v1385_v62  ;;  %464 = vst [vmem:[%s1395_s30 + $0x38] sm:$0xff] %v1387_v8 }
 0x145 PF: > { %p725_p0 = scmp.eq.s32.totalorder %s1094_s18, 0 }
 0x147   : > { %468 = sbr.rel (%p725_p0) target bundleno = 343 (0x157), region = 44 }
 0x14c   : > { %v469_v9 = vld [vmem:[%s1391_s27] sm:$0xff]  ;;  %v470_v10 = vld [vmem:[%s1391_s27 + $0x8] sm:$0xff]  ;;  %v471_v11 = vld [vmem:[%s1391_s27 + $0x10] sm:$0xff] }
 0x14d   : > { %v477_v12 = vadd.f32 %v469_v9, %v1371_v32  ;;  %v478_v13 = vadd.f32 %v470_v10, %v430_v44  ;;  %v479_v14 = vadd.f32 %v471_v11, %v431_v56  ;;  %v472_v15 = vld [vmem:[%s1391_s27 + $0x18] sm:$0xff]  ;;  %v473_v16 = vld [vmem:[%s1391_s27 + $0x20] sm:$0xff]  ;;  %v474_v17 = vld [vmem:[%s1391_s27 + $0x28] sm:$0xff] }
 0x14e   : > { %v480_v18 = vadd.f32 %v472_v15, %v432_v4  ;;  %v481_v19 = vadd.f32 %v473_v16, %v1373_v34  ;;  %v482_v20 = vadd.f32 %v474_v17, %v434_v46  ;;  %v475_v21 = vld [vmem:[%s1391_s27 + $0x30] sm:$0xff]  ;;  %v476_v22 = vld [vmem:[%s1391_s27 + $0x38] sm:$0xff]  ;;  %v493_v23 = vld [vmem:[%s1395_s30] sm:$0xff] }
 0x14f   : > { %485 = vst [vmem:[%s1391_s27] sm:$0xff] %v477_v12  ;;  %486 = vst [vmem:[%s1391_s27 + $0x8] sm:$0xff] %v478_v13  ;;  %v483_v24 = vadd.f32 %v475_v21, %v435_v58  ;;  %v484_v25 = vadd.f32 %v476_v22, %v436_v6  ;;  %v501_v26 = vadd.f32 %v493_v23, %v1375_v37  ;;  %v494_v27 = vld [vmem:[%s1395_s30 + $0x8] sm:$0xff]  ;;  %v495_v28 = vld [vmem:[%s1395_s30 + $0x10] sm:$0xff] }
 0x150   : > { %487 = vst [vmem:[%s1391_s27 + $0x10] sm:$0xff] %v479_v14  ;;  %v496_v29 = vld [vmem:[%s1395_s30 + $0x18] sm:$0xff]  ;;  %488 = vst [vmem:[%s1391_s27 + $0x18] sm:$0xff] %v480_v18  ;;  %v502_v30 = vadd.f32 %v494_v27, %v1379_v49  ;;  %v503_v31 = vadd.f32 %v495_v28, %v1383_v61  ;;  %v497_v33 = vld [vmem:[%s1395_s30 + $0x20] sm:$0xff] }
 0x151   : > { %489 = vst [vmem:[%s1391_s27 + $0x20] sm:$0xff] %v481_v19  ;;  %490 = vst [vmem:[%s1391_s27 + $0x28] sm:$0xff] %v482_v20  ;;  %v504_v32 = vadd.f32 %v496_v29, %v440_v7  ;;  %v498_v34 = vld [vmem:[%s1395_s30 + $0x28] sm:$0xff]  ;;  %v499_v35 = vld [vmem:[%s1395_s30 + $0x30] sm:$0xff]  ;;  %v505_v36 = vadd.f32 %v497_v33, %v1377_v38 }
 0x152   : > { %491 = vst [vmem:[%s1391_s27 + $0x30] sm:$0xff] %v483_v24  ;;  %492 = vst [vmem:[%s1391_s27 + $0x38] sm:$0xff] %v484_v25  ;;  %v506_v37 = vadd.f32 %v498_v34, %v1381_v50  ;;  %v507_v39 = vadd.f32 %v499_v35, %v1385_v62  ;;  %v500_v40 = vld [vmem:[%s1395_s30 + $0x38] sm:$0xff] }
 0x153   : > { %509 = vst [vmem:[%s1395_s30] sm:$0xff] %v501_v26  ;;  %510 = vst [vmem:[%s1395_s30 + $0x8] sm:$0xff] %v502_v30  ;;  %v508_v41 = vadd.f32 %v500_v40, %v1387_v8 }
 0x154   : > { %511 = vst [vmem:[%s1395_s30 + $0x10] sm:$0xff] %v503_v31  ;;  %512 = vst [vmem:[%s1395_s30 + $0x18] sm:$0xff] %v504_v32 }
 0x155   : > { %513 = vst [vmem:[%s1395_s30 + $0x20] sm:$0xff] %v505_v36  ;;  %514 = vst [vmem:[%s1395_s30 + $0x28] sm:$0xff] %v506_v37 }
 0x156   : > { %515 = vst [vmem:[%s1395_s30 + $0x30] sm:$0xff] %v507_v39  ;;  %516 = vst [vmem:[%s1395_s30 + $0x38] sm:$0xff] %v508_v41 }
 0x157 PF: > { %s1630_s18 = sld [smem:[#allocation15_spill]]  ;;  %s728_s28 = sshll.u32 %s1098_s19, 3 }
 0x158   : > { %s1631_s10 = sld [smem:[#allocation19_spill]]  ;;  %s538_s9 = sshll.u32 %s1391_s27, 4  ;;  %s1470_s9 = int_to_ptr.vmem [resolvable:$true] %s538_s9 }
 0x159   : > { %s1632_s12 = sld [smem:[#allocation24_spill]]  ;;  %s518_s24 = scalar_lea.sflag [#allocation4], %s1336_s4 }
 0x15a   : > { %s948_s19 = scalar_lea.vmem %s1470_s9, 1024  ;;  %s1128_s0 = smov [#allocation7]  }
 0x15b   : > { %p949_p7 = scmp.ne.s32.totalorder %s1470_s9, %s948_s19  ;;  %s952_s8 = sshll.u32 %s1128_s0, 4  ;;  %s953_s8 = int_to_ptr.vmem [resolvable:$false] %s952_s8 }
 0x15c   : > { %s954_s2 = scalar_lea.vmem %s953_s8, 2048  ;;  %p955_p8 = scmp.lt.s32.totalorder %s1470_s9, %s953_s8 }
 0x15d   : > { %s729_s5 = sshll.u32 %s1630_s18, 4  ;;  %p956_p9 = scmp.lt.s32.totalorder %s954_s2, %s948_s19 }
 0x15e   : > { %s1468_s25 = sadd.s32 %s729_s5, %s728_s28  ;;  %p1634_p13 = scmp.ne.s32.totalorder %s1631_s10, 0 }
 0x15f   : > { %s730_s21 = sshll.u32 %s1468_s25, 7  ;;  %s1633_s3 = smov %s1632_s12 }
 0x160   : > { %s1478_s22 = scalar_lea.hbm %s1632_s12, %s730_s21  ;;  %p950_p2 = pnand %p949_p7, %p1634_p13 }
 0x161   : > { %p957_p10 = por %p956_p9, %p955_p8 }
 0x162   : > { %p951_p6 = pneg %p950_p2 }
 0x164   : > { %p958_p12 = pnand %p957_p10, %p951_p6 }
 0x166   : > { %961 = shalt.err (!%p958_p12)
}
 0x167   : > { %s962_s26 = scalar_lea.hbm %s1478_s22, 1024  ;;  %s966_s18 = scalar_lea.hbm %s1633_s3, 4096 }
 0x168   : > { %p963_p1 = scmp.ne.s32.totalorder %s1478_s22, %s962_s26  ;;  %p967_p11 = scmp.lt.s32.totalorder %s1478_s22, %s1633_s3 }
 0x169   : > { %p968_p3 = scmp.lt.s32.totalorder %s966_s18, %s962_s26 }
 0x16a   : > { %p964_p4 = pnand %p963_p1, %p1634_p13 }
 0x16b   : > { %p969_p0 = por %p968_p3, %p967_p11 }
 0x16c   : > { %p965_p5 = pneg %p964_p4 }
 0x16e   : > { %p970_p7 = pnand %p969_p0, %p965_p5 }
 0x170   : > { %973 = shalt.err (!%p970_p7)
}
 0x171   : > { %s1129_s15 = smov 128   ;;  %s1130_s7 = smov 8  }
 0x172   : > { %758 = dma.vmem_to_hbm [thread:$0]  (%p1634_p13), %s1470_s9, 1024, %s1478_s22, %s518_s24, %s1129_s15, %s1129_s15, %s1130_s7  }
 0x173   : > { %s1635_s0 = sld [smem:[#allocation25_spill]]  ;;  %s556_s2 = sshll.u32 %s1395_s30, 4  ;;  %s1514_s2 = int_to_ptr.vmem [resolvable:$true] %s556_s2 }
 0x174   : > { %s523_s26 = scalar_lea.sflag [#allocation9], %s1336_s4  ;;  %s974_s6 = scalar_lea.vmem %s1514_s2, 1024 }
 0x175   : > { %p975_p2 = scmp.ne.s32.totalorder %s1514_s2, %s974_s6  ;;  %s1131_s27 = smov [#allocation8]  }
 0x176   : > { %s978_s9 = sshll.u32 %s1131_s27, 4  ;;  %s979_s9 = int_to_ptr.vmem [resolvable:$false] %s978_s9 }
 0x177   : > { %p976_p6 = pnand %p975_p2, %p1634_p13  ;;  %s980_s25 = scalar_lea.vmem %s979_s9, 2048 }
 0x178   : > { %p981_p9 = scmp.lt.s32.totalorder %s1514_s2, %s979_s9  ;;  %p982_p10 = scmp.lt.s32.totalorder %s980_s25, %s974_s6 }
 0x179   : > { %s1511_s8 = scalar_lea.hbm %s1635_s0, %s730_s21  ;;  %p977_p8 = pneg %p976_p6 }
 0x17a   : > { %p983_p12 = por %p982_p10, %p981_p9 }
 0x17c   : > { %p984_p1 = pnand %p983_p12, %p977_p8 }
 0x17e   : > { %987 = shalt.err (!%p984_p1)
}
 0x17f   : > { %s988_s30 = scalar_lea.hbm %s1511_s8, 1024  ;;  %s992_s22 = scalar_lea.hbm %s1635_s0, 4096 }
 0x180   : > { %p989_p4 = scmp.ne.s32.totalorder %s1511_s8, %s988_s30  ;;  %p993_p3 = scmp.lt.s32.totalorder %s1511_s8, %s1635_s0 }
 0x181   : > { %p994_p0 = scmp.lt.s32.totalorder %s992_s22, %s988_s30 }
 0x182   : > { %p990_p5 = pnand %p989_p4, %p1634_p13 }
 0x183   : > { %p995_p7 = por %p994_p0, %p993_p3 }
 0x184   : > { %p991_p11 = pneg %p990_p5 }
 0x186   : > { %p996_p2 = pnand %p995_p7, %p991_p11 }
 0x188   : > { %999 = shalt.err (!%p996_p2)
}
 0x189   : > { %759 = dma.vmem_to_hbm [thread:$0]  (%p1634_p13), %s1514_s2, 1024, %s1511_s8, %s523_s26, %s1129_s15, %s1129_s15, %s1130_s7  }
 0x18a PF: > { %s1636_s28 = sld [smem:[#allocation18_spill]] }
 0x18b   : > { %s1637_s5 = sld [smem:[#allocation14_spill]] }
 0x18c   : > { %s1638_s12 = sld [smem:[#allocation20_spill]] }
 0x190   : > { %p780_p6 = scmp.ge.s32.totalorder %s1636_s28, 2 }
 0x191   : > { %s571_s19 = sand.u32 1, %s1637_s5  }
 0x192   : > { %p1639_p8 = scmp.ne.s32.totalorder %s1638_s12, 0  ;;  %s572_s6 = scalar_lea.sflag [#allocation4], %s571_s19 }
 0x194   : > { %p771_p9 = pnand %p780_p6, %p1639_p8 }
 0x196   : > { %p772_p10 = pneg %p771_p9 }
 0x198   : > { %1061 = dma.done.wait (%p772_p10), %s572_s6, 1024  }
 0x199   : > { %1063 = vsyncadd (%p772_p10), %s572_s6, 4294966272  ;;  %s581_s27 = scalar_lea.sflag [#allocation9], %s571_s19 }
 0x19a   : > { %1065 = dma.done.wait (%p772_p10), %s581_s27, 1024  }
 0x19b   : > { %1067 = vsyncadd (%p772_p10), %s581_s27, 4294966272  ;;  %s24_s24 = sadd.s32 1, %s1636_s28   ;;  %s1641_s18 = sld [smem:[#allocation16_spill]] }
 0x19c   : > { %p1545_p12 = scmp.ge.s32.totalorder %s24_s24, 10   ;;  %s1642_s19 = sld [smem:[#allocation17_spill]] }
 0x19d   : > { %s1643_s22 = sld [smem:[#allocation21_spill]]  ;;  %s1644_s12 = smov %s1074_s13 }
 0x19e   : > { %s1645_s13 = smov %s1078_s14  ;;  %s1646_s14 = smov %s1308_s20 }
 0x19f   : > { %s1647_s15 = smov %s1086_s16  ;;  %s1648_s16 = smov %s1090_s17 }
 0x1a0   : > { %s1649_s17 = smov %s1311_s1  ;;  %s1650_s20 = smov %s1114_s23 }
 0x1a1   : > { %s1651_s21 = smov %s1654_s11  ;;  %s1652_s23 = smov %s1662_s29 }
 0x1a2   :  { %23 = sbr.rel (!%p1545_p12) target bundleno = 18 (0x12), region = 102 }
 0x1a7   :  { %586 = vsyncpa [#allocation3], 1 }
 0x1a8   :  { %588 = vsyncpa [#allocation3 + $0x1], 1 }
 0x1a9   :  { %589 = vsyncpa [#allocation6], 1 }
 0x1aa   :  { %590 = vsyncpa [#allocation4], 1 }
 0x1ab   :  { %592 = vsyncpa [#allocation4 + $0x1], 1 }
 0x1ac   :  { %593 = vsyncpa [#allocation9], 1 }
 0x1ad   :  { %595 = vsyncpa [#allocation9 + $0x1], 1 }

</bundles_post_ra>
